<compile_context>
chip_gen: v7x
topology: tpu7x:2x2x1
jax: 0.10.0
libtpu: 0.0.40
codegen_flags: <defaults>
</compile_context>

<pallas_src>
import functools

import jax
import jax.numpy as jnp
from jax import lax
from jax.experimental import pallas as pl
from jax.experimental.pallas import tpu as pltpu

_LANE = 128


def _sublane_multiple(dtype):
    """Second-to-last-dim packing requirement: 8 / 16 / 32 for 4 / 2 / 1 byte."""
    return max(8, 32 // jnp.dtype(dtype).itemsize)


def _vmem_budget_bytes():
    """Generation-aware scoped-VMEM budget for this kernel's pipeline buffers."""
    try:
        cap = pltpu.get_tpu_info().vmem_capacity_bytes  # 128 MiB v5e/v6e, 64 MiB v7x
    except Exception:
        cap = 64 << 20  # conservative fallback
    return int(min(cap // 2, 48 << 20))


def _pick_chunk_rows(R, step, target=64, min_grid=2):
    """Row chunk for the in-kernel recurrence: divisor of R, multiple of the
    sublane packing `step`, close to `target` (keeps f32 `mem` at ~8 vregs).
    Also avoids eating the whole row dim on tiny inputs so the grid can still
    have >= min_grid steps."""
    if R % step != 0:
        # Odd row counts: a single full-extent chunk is always layout-legal.
        # TODO(synk): masked-edge tiling for very large, oddly-sized layers.
        return R
    cap = min(R, target)
    if R // min_grid >= step:
        cap = min(cap, R // min_grid)
    best = step
    d = step
    while d <= cap:
        if R % d == 0:
            best = d
        d += step
    return best


def _pick_chunks_per_block(NC, chunk_bytes, budget_bytes, min_grid=2):
    """Chunks per DMA block: divisor of NC, sized so the double-buffered
    in+out blocks (~2x combined block bytes) fit the VMEM budget with
    headroom; prefers >= min_grid (even) grid steps for v7x megacore."""
    max_block_bytes = min(budget_bytes // 3, 16 << 20)
    cap = max(1, min(NC, max_block_bytes // chunk_bytes))
    if NC >= min_grid:
        cap = min(cap, NC // min_grid)
    divisors = [d for d in range(1, cap + 1) if NC % d == 0]
    best = divisors[-1]
    even = [d for d in divisors if (NC // d) % 2 == 0]
    if even and even[-1] * 2 >= best:
        best = even[-1]
    return best


def _lif_kernel(x_ref, o_ref, *, tau, thresh):
    """Full LIF recurrence for one (T, nc, sub, 128) block.

    For each row chunk the membrane potential is carried as a loop-local f32
    value across the statically unrolled T loop; chunks are walked with a
    lax.fori_loop so only one chunk's `mem` is live at a time.
    """
    T, nc, sub, lane = x_ref.shape
    tau = jnp.float32(tau)
    thresh = jnp.float32(thresh)
    # Spike constants in the output dtype, hoisted out of all loops.
    one = jnp.ones((sub, lane), o_ref.dtype)
    zero = jnp.zeros((sub, lane), o_ref.dtype)

    def chunk(c):
        mem = jnp.zeros((sub, lane), jnp.float32)
        for t in range(T):  # T is small (4..16 for typical SNNs): unrolled
            mem = mem * tau + x_ref[t, c].astype(jnp.float32)
            mask = mem > thresh
            o_ref[t, c] = jnp.where(mask, one, zero)
            mem = jnp.where(mask, mem - thresh, mem)  # soft reset

    if nc == 1:
        chunk(0)
    else:
        def body(c, carry):
            chunk(c)
            return carry
        lax.fori_loop(0, nc, body, 0)


def lif_spike(x, T, thresh=1.0, tau=0.5, out_dtype=None):
    """Pallas implementation of LIFSpike.forward (inference path).

    x: (T*B, C, H, W) array in its native float dtype (compute is f32).
    Returns 0/1-valued spikes of the same shape in `out_dtype`
    (default: x.dtype; bfloat16 is exact for spikes and halves write traffic).
    """
    if T == 0:
        # LIFSpike falls back to ReLU when T == 0.
        return jnp.maximum(x, 0)

    in_dtype = jnp.dtype(x.dtype)
    out_dtype = jnp.dtype(in_dtype if out_dtype is None else out_dtype)

    TB = x.shape[0]
    assert TB % T == 0, "leading dim must be T * batch"
    feat = 1
    for d in x.shape[1:]:
        feat *= d
    M = (TB // T) * feat  # elements per timestep

    # (T*B, C, H, W) row-major == (T, M); pad the per-timestep dim up to a
    # lane multiple (zero inputs never spike, so padding is inert).
    Mp = ((M + _LANE - 1) // _LANE) * _LANE
    x_seq = x.reshape(T, M)
    if Mp != M:
        x_seq = jnp.pad(x_seq, ((0, 0), (0, Mp - M)))
    R = Mp // _LANE

    step = max(_sublane_multiple(in_dtype), _sublane_multiple(out_dtype))
    budget = _vmem_budget_bytes()

    sub = _pick_chunk_rows(R, step)
    NC = R // sub
    chunk_bytes = T * sub * _LANE * (in_dtype.itemsize + out_dtype.itemsize)
    nc = _pick_chunks_per_block(NC, chunk_bytes, budget)
    grid = (NC // nc,)

    x_seq = x_seq.reshape(T, NC, sub, _LANE)

    kernel = functools.partial(_lif_kernel, tau=float(tau), thresh=float(thresh))

    out = pl.pallas_call(
        kernel,
        out_shape=jax.ShapeDtypeStruct((T, NC, sub, _LANE), out_dtype),
        grid=grid,
        in_specs=[pl.BlockSpec((T, nc, sub, _LANE), lambda i: (0, i, 0, 0))],
        out_specs=pl.BlockSpec((T, nc, sub, _LANE), lambda i: (0, i, 0, 0)),
        compiler_params=pltpu.CompilerParams(
            # Chunk groups are independent -> megacore sharding on v7x; the
            # temporal recurrence lives entirely inside the kernel.
            dimension_semantics=("parallel",),
            vmem_limit_bytes=budget,
        ),
        cost_estimate=pl.CostEstimate(
            flops=5 * T * Mp,
            transcendentals=0,
            bytes_accessed=T * Mp * (in_dtype.itemsize + out_dtype.itemsize),
        ),
    )(x_seq)

    out = out.reshape(T, Mp)
    if Mp != M:
        out = out[:, :M]
    # MergeTemporalDim: (T, B, C, H, W) -> (T*B, C, H, W)
    return out.reshape(x.shape)


def _lif_reference(x, T, thresh=1.0, tau=0.5):
    """Pure-JAX reference mirroring the PyTorch forward loop."""
    x32 = x.astype(jnp.float32)
    TB = x32.shape[0]
    B = TB // T
    x_seq = x32.reshape((T, B) + x32.shape[1:])
    mem = jnp.zeros((B,) + x32.shape[1:], jnp.float32)
    spikes = []
    for t in range(T):
        mem = mem * tau + x_seq[t]
        spike = (mem > thresh).astype(jnp.float32)
        mem = mem - spike * thresh
        spikes.append(spike)
    return jnp.stack(spikes, axis=0).reshape(x32.shape)


if __name__ == "__main__":
    # Test 1: float32 in/out, small shapes (matches the PyTorch module).
    T = 8
    B, C, H, W = 2, 4, 16, 16
    key = jax.random.PRNGKey(0)
    x = jax.random.normal(key, (T * B, C, H, W), dtype=jnp.float32) * 1.5

    out = jax.block_until_ready(lif_spike(x, T, thresh=1.0, tau=0.5))
    ref = _lif_reference(x, T, thresh=1.0, tau=0.5)
    assert out.shape == (T * B, C, H, W)
    assert out.dtype == jnp.float32
    assert jnp.allclose(out, ref, atol=1e-6), "f32 mismatch vs reference"

    # Test 2: native-bf16 input/output and a shape large enough to exercise
    # the in-kernel chunk fori_loop (more than one chunk per block).
    T2 = 4
    B2, C2, H2, W2 = 2, 16, 32, 32
    x2 = (jax.random.normal(jax.random.PRNGKey(1), (T2 * B2, C2, H2, W2),
                            dtype=jnp.float32) * 1.5).astype(jnp.bfloat16)
    out2 = jax.block_until_ready(lif_spike(x2, T2, thresh=1.0, tau=0.5))
    ref2 = _lif_reference(x2, T2, thresh=1.0, tau=0.5)
    assert out2.shape == x2.shape
    assert out2.dtype == jnp.bfloat16
    assert jnp.allclose(out2.astype(jnp.float32), ref2), "bf16 mismatch vs reference"

    print("KERNEL_OK")
</pallas_src>

<mosaic_0001>
module attributes {stable_mosaic.version = 11 : i64} {
  func.func @_lif_kernel(%arg0: i32, %arg1: memref<8x1x8x128xf32, #tpu.memory_space<vmem>>, %arg2: memref<8x1x8x128xf32, #tpu.memory_space<vmem>>) attributes {dimension_semantics = [#tpu.dimension_semantics<parallel>], iteration_bounds = array<i64: 2>, scalar_prefetch = 0 : i64, scratch_operands = 0 : i64, tpu.core_type = #tpu.core_type<tc>, window_params = [{transform_indices = @transform_0, window_bounds = array<i64: 8, 1, 8, 128>}, {transform_indices = @transform_1, window_bounds = array<i64: 8, 1, 8, 128>}]} {
    %cst = arith.constant 1.000000e+00 : f32
    %0 = vector.broadcast %cst : f32 to vector<8x128xf32>
    %cst_0 = arith.constant 0.000000e+00 : f32
    %1 = vector.broadcast %cst_0 : f32 to vector<8x128xf32>
    %cst_1 = arith.constant 0.000000e+00 : f32
    %2 = vector.broadcast %cst_1 : f32 to vector<8x128xf32>
    %cst_2 = arith.constant 5.000000e-01 : f32
    %3 = vector.broadcast %cst_2 : f32 to vector<8x128xf32>
    %4 = arith.mulf %2, %3 : vector<8x128xf32>
    %c0 = arith.constant 0 : index
    %c0_3 = arith.constant 0 : index
    %c0_4 = arith.constant 0 : index
    %c0_5 = arith.constant 0 : index
    %5 = vector.load %arg1[%c0, %c0_3, %c0_4, %c0_5] : memref<8x1x8x128xf32, #tpu.memory_space<vmem>>, vector<1x1x8x128xf32>
    %6 = vector.shape_cast %5 : vector<1x1x8x128xf32> to vector<8x128xf32>
    %7 = arith.addf %4, %6 : vector<8x128xf32>
    %cst_6 = arith.constant 1.000000e+00 : f32
    %8 = vector.broadcast %cst_6 : f32 to vector<8x128xf32>
    %9 = arith.cmpf ogt, %7, %8 : vector<8x128xf32>
    %10 = arith.select %9, %0, %1 : vector<8x128xi1>, vector<8x128xf32>
    %c0_7 = arith.constant 0 : index
    %c0_8 = arith.constant 0 : index
    %c0_9 = arith.constant 0 : index
    %c0_10 = arith.constant 0 : index
    %11 = vector.load %arg2[%c0_7, %c0_8, %c0_9, %c0_10] : memref<8x1x8x128xf32, #tpu.memory_space<vmem>>, vector<1x1x8x128xf32>
    %12 = vector.shape_cast %11 : vector<1x1x8x128xf32> to vector<8x128xf32>
    %13 = vector.shape_cast %10 : vector<8x128xf32> to vector<1x1x8x128xf32>
    tpu.vector_store %arg2[%c0_7, %c0_8, %c0_9, %c0_10], %13 {strides = array<i32>} : memref<8x1x8x128xf32, #tpu.memory_space<vmem>>, vector<1x1x8x128xf32>,
    %cst_11 = arith.constant 1.000000e+00 : f32
    %14 = vector.broadcast %cst_11 : f32 to vector<8x128xf32>
    %15 = arith.subf %7, %14 : vector<8x128xf32>
    %16 = arith.select %9, %15, %7 : vector<8x128xi1>, vector<8x128xf32>
    %cst_12 = arith.constant 5.000000e-01 : f32
    %17 = vector.broadcast %cst_12 : f32 to vector<8x128xf32>
    %18 = arith.mulf %16, %17 : vector<8x128xf32>
    %c1 = arith.constant 1 : index
    %c0_13 = arith.constant 0 : index
    %c0_14 = arith.constant 0 : index
    %c0_15 = arith.constant 0 : index
    %19 = vector.load %arg1[%c1, %c0_13, %c0_14, %c0_15] : memref<8x1x8x128xf32, #tpu.memory_space<vmem>>, vector<1x1x8x128xf32>
    %20 = vector.shape_cast %19 : vector<1x1x8x128xf32> to vector<8x128xf32>
    %21 = arith.addf %18, %20 : vector<8x128xf32>
    %cst_16 = arith.constant 1.000000e+00 : f32
    %22 = vector.broadcast %cst_16 : f32 to vector<8x128xf32>
    %23 = arith.cmpf ogt, %21, %22 : vector<8x128xf32>
    %24 = arith.select %23, %0, %1 : vector<8x128xi1>, vector<8x128xf32>
    %c1_17 = arith.constant 1 : index
    %c0_18 = arith.constant 0 : index
    %c0_19 = arith.constant 0 : index
    %c0_20 = arith.constant 0 : index
    %25 = vector.load %arg2[%c1_17, %c0_18, %c0_19, %c0_20] : memref<8x1x8x128xf32, #tpu.memory_space<vmem>>, vector<1x1x8x128xf32>
    %26 = vector.shape_cast %25 : vector<1x1x8x128xf32> to vector<8x128xf32>
    %27 = vector.shape_cast %24 : vector<8x128xf32> to vector<1x1x8x128xf32>
    tpu.vector_store %arg2[%c1_17, %c0_18, %c0_19, %c0_20], %27 {strides = array<i32>} : memref<8x1x8x128xf32, #tpu.memory_space<vmem>>, vector<1x1x8x128xf32>,
    %cst_21 = arith.constant 1.000000e+00 : f32
    %28 = vector.broadcast %cst_21 : f32 to vector<8x128xf32>
    %29 = arith.subf %21, %28 : vector<8x128xf32>
    %30 = arith.select %23, %29, %21 : vector<8x128xi1>, vector<8x128xf32>
    %cst_22 = arith.constant 5.000000e-01 : f32
    %31 = vector.broadcast %cst_22 : f32 to vector<8x128xf32>
    %32 = arith.mulf %30, %31 : vector<8x128xf32>
    %c2 = arith.constant 2 : index
    %c0_23 = arith.constant 0 : index
    %c0_24 = arith.constant 0 : index
    %c0_25 = arith.constant 0 : index
    %33 = vector.load %arg1[%c2, %c0_23, %c0_24, %c0_25] : memref<8x1x8x128xf32, #tpu.memory_space<vmem>>, vector<1x1x8x128xf32>
    %34 = vector.shape_cast %33 : vector<1x1x8x128xf32> to vector<8x128xf32>
    %35 = arith.addf %32, %34 : vector<8x128xf32>
    %cst_26 = arith.constant 1.000000e+00 : f32
    %36 = vector.broadcast %cst_26 : f32 to vector<8x128xf32>
    %37 = arith.cmpf ogt, %35, %36 : vector<8x128xf32>
    %38 = arith.select %37, %0, %1 : vector<8x128xi1>, vector<8x128xf32>
    %c2_27 = arith.constant 2 : index
    %c0_28 = arith.constant 0 : index
    %c0_29 = arith.constant 0 : index
    %c0_30 = arith.constant 0 : index
    %39 = vector.load %arg2[%c2_27, %c0_28, %c0_29, %c0_30] : memref<8x1x8x128xf32, #tpu.memory_space<vmem>>, vector<1x1x8x128xf32>
    %40 = vector.shape_cast %39 : vector<1x1x8x128xf32> to vector<8x128xf32>
    %41 = vector.shape_cast %38 : vector<8x128xf32> to vector<1x1x8x128xf32>
    tpu.vector_store %arg2[%c2_27, %c0_28, %c0_29, %c0_30], %41 {strides = array<i32>} : memref<8x1x8x128xf32, #tpu.memory_space<vmem>>, vector<1x1x8x128xf32>,
    %cst_31 = arith.constant 1.000000e+00 : f32
    %42 = vector.broadcast %cst_31 : f32 to vector<8x128xf32>
    %43 = arith.subf %35, %42 : vector<8x128xf32>
    %44 = arith.select %37, %43, %35 : vector<8x128xi1>, vector<8x128xf32>
    %cst_32 = arith.constant 5.000000e-01 : f32
    %45 = vector.broadcast %cst_32 : f32 to vector<8x128xf32>
    %46 = arith.mulf %44, %45 : vector<8x128xf32>
    %c3 = arith.constant 3 : index
    %c0_33 = arith.constant 0 : index
    %c0_34 = arith.constant 0 : index
    %c0_35 = arith.constant 0 : index
    %47 = vector.load %arg1[%c3, %c0_33, %c0_34, %c0_35] : memref<8x1x8x128xf32, #tpu.memory_space<vmem>>, vector<1x1x8x128xf32>
    %48 = vector.shape_cast %47 : vector<1x1x8x128xf32> to vector<8x128xf32>
    %49 = arith.addf %46, %48 : vector<8x128xf32>
    %cst_36 = arith.constant 1.000000e+00 : f32
    %50 = vector.broadcast %cst_36 : f32 to vector<8x128xf32>
    %51 = arith.cmpf ogt, %49, %50 : vector<8x128xf32>
    %52 = arith.select %51, %0, %1 : vector<8x128xi1>, vector<8x128xf32>
    %c3_37 = arith.constant 3 : index
    %c0_38 = arith.constant 0 : index
    %c0_39 = arith.constant 0 : index
    %c0_40 = arith.constant 0 : index
    %53 = vector.load %arg2[%c3_37, %c0_38, %c0_39, %c0_40] : memref<8x1x8x128xf32, #tpu.memory_space<vmem>>, vector<1x1x8x128xf32>
    %54 = vector.shape_cast %53 : vector<1x1x8x128xf32> to vector<8x128xf32>
    %55 = vector.shape_cast %52 : vector<8x128xf32> to vector<1x1x8x128xf32>
    tpu.vector_store %arg2[%c3_37, %c0_38, %c0_39, %c0_40], %55 {strides = array<i32>} : memref<8x1x8x128xf32, #tpu.memory_space<vmem>>, vector<1x1x8x128xf32>,
    %cst_41 = arith.constant 1.000000e+00 : f32
    %56 = vector.broadcast %cst_41 : f32 to vector<8x128xf32>
    %57 = arith.subf %49, %56 : vector<8x128xf32>
    %58 = arith.select %51, %57, %49 : vector<8x128xi1>, vector<8x128xf32>
    %cst_42 = arith.constant 5.000000e-01 : f32
    %59 = vector.broadcast %cst_42 : f32 to vector<8x128xf32>
    %60 = arith.mulf %58, %59 : vector<8x128xf32>
    %c4 = arith.constant 4 : index
    %c0_43 = arith.constant 0 : index
    %c0_44 = arith.constant 0 : index
    %c0_45 = arith.constant 0 : index
    %61 = vector.load %arg1[%c4, %c0_43, %c0_44, %c0_45] : memref<8x1x8x128xf32, #tpu.memory_space<vmem>>, vector<1x1x8x128xf32>
    %62 = vector.shape_cast %61 : vector<1x1x8x128xf32> to vector<8x128xf32>
    %63 = arith.addf %60, %62 : vector<8x128xf32>
    %cst_46 = arith.constant 1.000000e+00 : f32
    %64 = vector.broadcast %cst_46 : f32 to vector<8x128xf32>
    %65 = arith.cmpf ogt, %63, %64 : vector<8x128xf32>
    %66 = arith.select %65, %0, %1 : vector<8x128xi1>, vector<8x128xf32>
    %c4_47 = arith.constant 4 : index
    %c0_48 = arith.constant 0 : index
    %c0_49 = arith.constant 0 : index
    %c0_50 = arith.constant 0 : index
    %67 = vector.load %arg2[%c4_47, %c0_48, %c0_49, %c0_50] : memref<8x1x8x128xf32, #tpu.memory_space<vmem>>, vector<1x1x8x128xf32>
    %68 = vector.shape_cast %67 : vector<1x1x8x128xf32> to vector<8x128xf32>
    %69 = vector.shape_cast %66 : vector<8x128xf32> to vector<1x1x8x128xf32>
    tpu.vector_store %arg2[%c4_47, %c0_48, %c0_49, %c0_50], %69 {strides = array<i32>} : memref<8x1x8x128xf32, #tpu.memory_space<vmem>>, vector<1x1x8x128xf32>,
    %cst_51 = arith.constant 1.000000e+00 : f32
    %70 = vector.broadcast %cst_51 : f32 to vector<8x128xf32>
    %71 = arith.subf %63, %70 : vector<8x128xf32>
    %72 = arith.select %65, %71, %63 : vector<8x128xi1>, vector<8x128xf32>
    %cst_52 = arith.constant 5.000000e-01 : f32
    %73 = vector.broadcast %cst_52 : f32 to vector<8x128xf32>
    %74 = arith.mulf %72, %73 : vector<8x128xf32>
    %c5 = arith.constant 5 : index
    %c0_53 = arith.constant 0 : index
    %c0_54 = arith.constant 0 : index
    %c0_55 = arith.constant 0 : index
    %75 = vector.load %arg1[%c5, %c0_53, %c0_54, %c0_55] : memref<8x1x8x128xf32, #tpu.memory_space<vmem>>, vector<1x1x8x128xf32>
    %76 = vector.shape_cast %75 : vector<1x1x8x128xf32> to vector<8x128xf32>
    %77 = arith.addf %74, %76 : vector<8x128xf32>
    %cst_56 = arith.constant 1.000000e+00 : f32
    %78 = vector.broadcast %cst_56 : f32 to vector<8x128xf32>
    %79 = arith.cmpf ogt, %77, %78 : vector<8x128xf32>
    %80 = arith.select %79, %0, %1 : vector<8x128xi1>, vector<8x128xf32>
    %c5_57 = arith.constant 5 : index
    %c0_58 = arith.constant 0 : index
    %c0_59 = arith.constant 0 : index
    %c0_60 = arith.constant 0 : index
    %81 = vector.load %arg2[%c5_57, %c0_58, %c0_59, %c0_60] : memref<8x1x8x128xf32, #tpu.memory_space<vmem>>, vector<1x1x8x128xf32>
    %82 = vector.shape_cast %81 : vector<1x1x8x128xf32> to vector<8x128xf32>
    %83 = vector.shape_cast %80 : vector<8x128xf32> to vector<1x1x8x128xf32>
    tpu.vector_store %arg2[%c5_57, %c0_58, %c0_59, %c0_60], %83 {strides = array<i32>} : memref<8x1x8x128xf32, #tpu.memory_space<vmem>>, vector<1x1x8x128xf32>,
    %cst_61 = arith.constant 1.000000e+00 : f32
    %84 = vector.broadcast %cst_61 : f32 to vector<8x128xf32>
    %85 = arith.subf %77, %84 : vector<8x128xf32>
    %86 = arith.select %79, %85, %77 : vector<8x128xi1>, vector<8x128xf32>
    %cst_62 = arith.constant 5.000000e-01 : f32
    %87 = vector.broadcast %cst_62 : f32 to vector<8x128xf32>
    %88 = arith.mulf %86, %87 : vector<8x128xf32>
    %c6 = arith.constant 6 : index
    %c0_63 = arith.constant 0 : index
    %c0_64 = arith.constant 0 : index
    %c0_65 = arith.constant 0 : index
    %89 = vector.load %arg1[%c6, %c0_63, %c0_64, %c0_65] : memref<8x1x8x128xf32, #tpu.memory_space<vmem>>, vector<1x1x8x128xf32>
    %90 = vector.shape_cast %89 : vector<1x1x8x128xf32> to vector<8x128xf32>
    %91 = arith.addf %88, %90 : vector<8x128xf32>
    %cst_66 = arith.constant 1.000000e+00 : f32
    %92 = vector.broadcast %cst_66 : f32 to vector<8x128xf32>
    %93 = arith.cmpf ogt, %91, %92 : vector<8x128xf32>
    %94 = arith.select %93, %0, %1 : vector<8x128xi1>, vector<8x128xf32>
    %c6_67 = arith.constant 6 : index
    %c0_68 = arith.constant 0 : index
    %c0_69 = arith.constant 0 : index
    %c0_70 = arith.constant 0 : index
    %95 = vector.load %arg2[%c6_67, %c0_68, %c0_69, %c0_70] : memref<8x1x8x128xf32, #tpu.memory_space<vmem>>, vector<1x1x8x128xf32>
    %96 = vector.shape_cast %95 : vector<1x1x8x128xf32> to vector<8x128xf32>
    %97 = vector.shape_cast %94 : vector<8x128xf32> to vector<1x1x8x128xf32>
    tpu.vector_store %arg2[%c6_67, %c0_68, %c0_69, %c0_70], %97 {strides = array<i32>} : memref<8x1x8x128xf32, #tpu.memory_space<vmem>>, vector<1x1x8x128xf32>,
    %cst_71 = arith.constant 1.000000e+00 : f32
    %98 = vector.broadcast %cst_71 : f32 to vector<8x128xf32>
    %99 = arith.subf %91, %98 : vector<8x128xf32>
    %100 = arith.select %93, %99, %91 : vector<8x128xi1>, vector<8x128xf32>
    %cst_72 = arith.constant 5.000000e-01 : f32
    %101 = vector.broadcast %cst_72 : f32 to vector<8x128xf32>
    %102 = arith.mulf %100, %101 : vector<8x128xf32>
    %c7 = arith.constant 7 : index
    %c0_73 = arith.constant 0 : index
    %c0_74 = arith.constant 0 : index
    %c0_75 = arith.constant 0 : index
    %103 = vector.load %arg1[%c7, %c0_73, %c0_74, %c0_75] : memref<8x1x8x128xf32, #tpu.memory_space<vmem>>, vector<1x1x8x128xf32>
    %104 = vector.shape_cast %103 : vector<1x1x8x128xf32> to vector<8x128xf32>
    %105 = arith.addf %102, %104 : vector<8x128xf32>
    %cst_76 = arith.constant 1.000000e+00 : f32
    %106 = vector.broadcast %cst_76 : f32 to vector<8x128xf32>
    %107 = arith.cmpf ogt, %105, %106 : vector<8x128xf32>
    %108 = arith.select %107, %0, %1 : vector<8x128xi1>, vector<8x128xf32>
    %c7_77 = arith.constant 7 : index
    %c0_78 = arith.constant 0 : index
    %c0_79 = arith.constant 0 : index
    %c0_80 = arith.constant 0 : index
    %109 = vector.load %arg2[%c7_77, %c0_78, %c0_79, %c0_80] : memref<8x1x8x128xf32, #tpu.memory_space<vmem>>, vector<1x1x8x128xf32>
    %110 = vector.shape_cast %109 : vector<1x1x8x128xf32> to vector<8x128xf32>
    %111 = vector.shape_cast %108 : vector<8x128xf32> to vector<1x1x8x128xf32>
    tpu.vector_store %arg2[%c7_77, %c0_78, %c0_79, %c0_80], %111 {strides = array<i32>} : memref<8x1x8x128xf32, #tpu.memory_space<vmem>>, vector<1x1x8x128xf32>,
    return
  }
  func.func @transform_0(%arg0: i32) -> (i32, i32, i32, i32) {
    %c0_i32 = arith.constant 0 : i32
    %c0_i32_0 = arith.constant 0 : i32
    %c0_i32_1 = arith.constant 0 : i32
    %c0_i32_2 = arith.constant 0 : i32
    return %c0_i32, %arg0, %c0_i32_0, %c0_i32_1 : i32, i32, i32, i32
  }
  func.func @transform_1(%arg0: i32) -> (i32, i32, i32, i32) {
    %c0_i32 = arith.constant 0 : i32
    %c0_i32_0 = arith.constant 0 : i32
    %c0_i32_1 = arith.constant 0 : i32
    %c0_i32_2 = arith.constant 0 : i32
    return %c0_i32, %arg0, %c0_i32_0, %c0_i32_1 : i32, i32, i32, i32
  }
}

</mosaic_0001>

<bundles_post_ra>
// kernel: tpu_custom_call.1
= control target key start
LH: loop header
LB: loop body
LE: loop exit
PB: predicated region body
PF: predicated region fallthrough
CT: control target
= control target key end

     0   :  { %6 = vsyncpa [#allocation3], 0  ;;  %s683_s0 = inlined_call_operand.hbm [shape: f32[8,2,8,128], index: 0, kind: input, shape index: {}]   ;;  %s684_s1 = inlined_call_operand.hbm [shape: f32[8,2,8,128], index: 1, kind: output, shape index: {}]  }
   0x1   :  { %8 = vsyncpa [#allocation3 + $0x1], 0 }
   0x2   :  { %9 = vsyncpa [#allocation4], 0 }
   0x3   :  { %11 = vsyncpa [#allocation4 + $0x1], 0  ;;  %s498_s6 = smov 0   ;;  %s500_s7 = smov 0  }
   0x4   :  { %s502_s8 = smov 0   ;;  %s504_s9 = smov 0  }
   0x5 LB: > { %s519_s10 = sadd.s32 4294967295, %s477_s9   ;;  %s295_s11 = sadd.s32 4294967294, %s477_s9   ;;  %s477_s9 = sphi %s504_s9, %s698_s9   ;;  %s473_s8 = sphi %s502_s8, %s697_s8   ;;  %s469_s7 = sphi %s500_s7, %s696_s7   ;;  %s465_s6 = sphi %s498_s6, %s695_s6  }
   0x6   : > { %s523_s12 = sadd.s32 1, %s477_s9   ;;  %s24_s13 = sadd.s32 1, %s473_s8 }
   0x7   : > { %s21_s14 = ssub.s32 %s477_s9, %s523_s12  ;;  %p31_p0 = scmp.ne.s32.totalorder %s473_s8, %s469_s7 }
   0x8   : > { %p22_p1 = scmp.eq.s32.totalorder %s21_s14, 0  ;;  %p32_p2 = scmp.eq.s32.totalorder %s477_s9, 0 }
   0x9   : > { %p37_p3 = scmp.ne.s32.totalorder %s469_s7, %s465_s6  ;;  %p38_p4 = scmp.eq.s32.totalorder %s519_s10, 0 }
   0xa   : > { %s535_s15 = scalar_select %p22_p1, %s473_s8, %s24_s13  }
   0xb   : > { %p537_p5 = por %p32_p2, %p31_p0  ;;  %p541_p6 = por %p38_p4, %p37_p3 }
   0xc   : > { %p61_p7 = scmp.eq.s32.totalorder %s519_s10, 1  ;;  %p67_p8 = scmp.eq.s32.totalorder %s295_s11, 1 }
   0xd   : > { %p340_p10 = scmp.lt.s32.totalorder %s477_s9, 2  ;;  %s87_s20 = sand.u32 1, %s473_s8  }
   0xe   : > { %p548_p11 = por %p61_p7, %p31_p0  ;;  %p552_p12 = por %p67_p8, %p37_p3 }
   0xf   : > { %s299_s21 = sshll.u32 %s477_s9, 7  ;;  %s298_s22 = sshll.u32 %s87_s20, 6 }
  0x10   : > { %s688_s18 = scalar_select %p548_p11, 1, 0 }
  0x11   : > { %s689_s19 = scalar_select %p552_p12, 1, 0 }
  0x12   : > { %s561_s25 = scalar_lea.hbm %s683_s0, %s299_s21  ;;  %s91_s26 = scalar_lea.vmem [#allocation2], %s298_s22 }
  0x13   : > { %s97_s27 = sshll.u32 %s91_s26, 4  ;;  %p565_p13 = pnand %p340_p10, %p537_p5  ;;  %s569_s27 = int_to_ptr.vmem [resolvable:$true] %s97_s27 }
  0x14   : > { %s572_s29 = scalar_lea.sflag [#allocation3], %s87_s20  ;;  %s381_s30 = scalar_lea.hbm %s561_s25, 1024 }
  0x15   : > { %p382_p1 = scmp.ne.s32.totalorder %s561_s25, %s381_s30  ;;  %p383_p2 = pneg %p565_p13 }
  0x16   : > { %s386_s4 = scalar_lea.hbm %s683_s0, 2048  ;;  %p387_p5 = scmp.lt.u32.totalorder %s561_s25, %s683_s0 }
  0x17   : > { %p384_p3 = pnand %p383_p2, %p382_p1  ;;  %p388_p7 = scmp.lt.u32.totalorder %s386_s4, %s381_s30 }
  0x18   : > { %p390_p10 = scmp.lt.u32.totalorder %s381_s30, %s561_s25 }
  0x19   : > { %p385_p4 = pneg %p384_p3  ;;  %p389_p8 = por %p388_p7, %p387_p5 }
  0x1b   : > { %p391_p9 = por %p390_p10, %p389_p8 }
  0x1d   : > { %p392_p0 = pnand %p391_p9, %p385_p4 }
  0x1f   : > { %395 = shalt.err (!%p392_p0)
}
  0x20   : > { %s396_s13 = scalar_lea.vmem %s569_s27, 1024  ;;  %s479_s14 = smov [#allocation2]  }
  0x21   : > { %p397_p1 = scmp.ne.s32.totalorder %s569_s27, %s396_s13  ;;  %s401_s16 = sshll.u32 %s479_s14, 4  ;;  %s402_s16 = int_to_ptr.vmem [resolvable:$false] %s401_s16 }
  0x22   : > { %s403_s20 = scalar_lea.vmem %s402_s16, 2048  ;;  %p404_p11 = scmp.lt.s32.totalorder %s569_s27, %s402_s16 }
  0x23   : > { %p399_p3 = pnand %p397_p1, %p383_p2  ;;  %p405_p5 = scmp.lt.s32.totalorder %s403_s20, %s396_s13 }
  0x25   : > { %p400_p12 = pneg %p399_p3  ;;  %p406_p7 = por %p405_p5, %p404_p11 }
  0x27   : > { %p407_p8 = pnand %p406_p7, %p400_p12 }
  0x29   : > { %410 = shalt.err (!%p407_p8)
}
  0x2a   : > { %s480_s21 = smov 256   ;;  %s481_s22 = smov 128  }
  0x2b   : > { %s482_s23 = smov 8   ;;  %p105_p9 = scmp.lt.s32.totalorder %s477_s9, 3 }
  0x2c   : > { %335 = dma.hbm_to_vmem [thread:$0]  (!%p565_p13), %s561_s25, 1024, %s569_s27, %s572_s29, %s480_s21, %s481_s22, %s482_s23  }
  0x2d   : > { %p691_p0 = scmp.ge.s32.totalorder %s477_s9, 1 }
  0x2f   : > { %p106_p2 = pnand %p691_p0, %p105_p9 }
  0x30   : > { %s604_s24 = sand.u32 (!%p106_p2), 1, %s469_s7  }
  0x31   : > { %109 = sbr.rel (%p106_p2) target bundleno = 125 (0x7d), region = 24  ;;  %s301_s26 = sshll.u32 (!%p106_p2), %s604_s24, 6 }
  0x32   : > { %s112_s30 = scalar_lea.sflag (!%p106_p2), [#allocation3], %s604_s24  ;;  %s608_s2 = scalar_lea.vmem (!%p106_p2), [#allocation2], %s301_s26 }
  0x38   : > { %456 = dma.done.wait (%p541_p6), %s112_s30, 1024  }
  0x39   : > { %458 = vsyncadd (%p541_p6), %s112_s30, 4294966272  ;;  %v134_v0 = vld [vmem:[%s608_s2] sm:$0xff]  ;;  %v483_v2 = vmov 0.0   ;;  %s615_s25 = scalar_lea.vmem [#allocation5], %s301_s26  ;;  %v304_v5 = vld [vmem:[%s608_s2 + $0x8] sm:$0xff]  ;;  %s325_s27 = sshll.u32 %s519_s10, 7 }
  0x3a   : > { %vm136_vm0 = vcmp.gt.f32.partialorder %v134_v0, 1.0  ;;  %v303_v1 = vadd.f32 -1.0, %v134_v0  ;;  %v307_v11 = vld [vmem:[%s608_s2 + $0x10] sm:$0xff]  ;;  %v310_v17 = vld [vmem:[%s608_s2 + $0x18] sm:$0xff]  ;;  %v313_v23 = vld [vmem:[%s608_s2 + $0x20] sm:$0xff]  ;;  %s222_s17 = sshll.u32 %s615_s25, 4  ;;  %s638_s3 = scalar_lea.hbm %s684_s1, %s325_s27  ;;  %s633_s17 = int_to_ptr.vmem [resolvable:$true] %s222_s17 }
  0x3b   : > { %v137_v3 = vsel %vm136_vm0, 1.0, %v483_v2  ;;  %v316_v29 = vld [vmem:[%s608_s2 + $0x28] sm:$0xff]  ;;  %v319_v35 = vld [vmem:[%s608_s2 + $0x30] sm:$0xff]  ;;  %v322_v41 = vld [vmem:[%s608_s2 + $0x38] sm:$0xff]  ;;  %s210_s4 = scalar_lea.sflag [#allocation4], %s604_s24  ;;  %s411_s5 = scalar_lea.vmem %s633_s17, 1024 }
  0x3c   : > { %138 = vst [vmem:[%s615_s25] sm:$0xff] %v137_v3  ;;  %v140_v4 = vsel %vm136_vm0, %v303_v1, %v134_v0  ;;  %p412_p6 = scmp.ne.s32.totalorder %s633_s17, %s411_s5  ;;  %p692_p11 = scmp.ne.s32.totalorder %s688_s18, 0 }
  0x3d   : > { %v141_v6 = vmul.f32 0.5, %v140_v4  ;;  %s484_s10 = smov [#allocation5]  }
  0x3e   : > { %p413_p12 = pnand %p412_p6, %p692_p11  ;;  %s415_s11 = sshll.u32 %s484_s10, 4  ;;  %s416_s11 = int_to_ptr.vmem [resolvable:$false] %s415_s11 }
  0x3f   : > { %v144_v7 = vadd.f32 %v304_v5, %v141_v6  ;;  %s417_s13 = scalar_lea.vmem %s416_s11, 2048  ;;  %p418_p4 = scmp.lt.s32.totalorder %s633_s17, %s416_s11 }
  0x40   : > { %p414_p13 = pneg %p413_p12  ;;  %p419_p10 = scmp.lt.s32.totalorder %s417_s13, %s411_s5 }
  0x41   : > { %vm145_vm1 = vcmp.gt.f32.partialorder %v144_v7, 1.0  ;;  %v306_v8 = vadd.f32 -1.0, %v144_v7 }
  0x42   : > { %v146_v9 = vsel %vm145_vm1, 1.0, %v483_v2  ;;  %p420_p1 = por %p419_p10, %p418_p4 }
  0x43   : > { %305 = vst [vmem:[%s615_s25 + $0x8] sm:$0xff] %v146_v9  ;;  %v150_v10 = vsel %vm145_vm1, %v306_v8, %v144_v7 }
  0x44   : > { %v151_v12 = vmul.f32 0.5, %v150_v10  ;;  %p421_p3 = pnand %p420_p1, %p414_p13 }
  0x46   : > { %v154_v13 = vadd.f32 %v307_v11, %v151_v12 }
  0x48   : > { %vm155_vm2 = vcmp.gt.f32.partialorder %v154_v13, 1.0  ;;  %v309_v14 = vadd.f32 -1.0, %v154_v13 }
  0x49   : > { %v156_v15 = vsel %vm155_vm2, 1.0, %v483_v2 }
  0x4a   : > { %308 = vst [vmem:[%s615_s25 + $0x10] sm:$0xff] %v156_v15  ;;  %v160_v16 = vsel %vm155_vm2, %v309_v14, %v154_v13 }
  0x4b   : > { %v161_v18 = vmul.f32 0.5, %v160_v16 }
  0x4d   : > { %v164_v19 = vadd.f32 %v310_v17, %v161_v18 }
  0x4f   : > { %vm165_vm3 = vcmp.gt.f32.partialorder %v164_v19, 1.0  ;;  %v312_v20 = vadd.f32 -1.0, %v164_v19 }
  0x50   : > { %v166_v21 = vsel %vm165_vm3, 1.0, %v483_v2 }
  0x51   : > { %311 = vst [vmem:[%s615_s25 + $0x18] sm:$0xff] %v166_v21  ;;  %v170_v22 = vsel %vm165_vm3, %v312_v20, %v164_v19 }
  0x52   : > { %v171_v24 = vmul.f32 0.5, %v170_v22 }
  0x54   : > { %v174_v25 = vadd.f32 %v313_v23, %v171_v24 }
  0x56   : > { %vm175_vm4 = vcmp.gt.f32.partialorder %v174_v25, 1.0  ;;  %v315_v26 = vadd.f32 -1.0, %v174_v25 }
  0x57   : > { %v176_v27 = vsel %vm175_vm4, 1.0, %v483_v2 }
  0x58   : > { %314 = vst [vmem:[%s615_s25 + $0x20] sm:$0xff] %v176_v27  ;;  %v180_v28 = vsel %vm175_vm4, %v315_v26, %v174_v25 }
  0x59   : > { %v181_v30 = vmul.f32 0.5, %v180_v28 }
  0x5b   : > { %v184_v31 = vadd.f32 %v316_v29, %v181_v30 }
  0x5d   : > { %vm185_vm5 = vcmp.gt.f32.partialorder %v184_v31, 1.0  ;;  %v318_v32 = vadd.f32 -1.0, %v184_v31 }
  0x5e   : > { %v186_v33 = vsel %vm185_vm5, 1.0, %v483_v2 }
  0x5f   : > { %317 = vst [vmem:[%s615_s25 + $0x28] sm:$0xff] %v186_v33  ;;  %v190_v34 = vsel %vm185_vm5, %v318_v32, %v184_v31 }
  0x60   : > { %v191_v36 = vmul.f32 0.5, %v190_v34 }
  0x62   : > { %v194_v37 = vadd.f32 %v319_v35, %v191_v36 }
  0x64   : > { %vm195_vm6 = vcmp.gt.f32.partialorder %v194_v37, 1.0  ;;  %v321_v38 = vadd.f32 -1.0, %v194_v37 }
  0x65   : > { %v196_v39 = vsel %vm195_vm6, 1.0, %v483_v2 }
  0x66   : > { %320 = vst [vmem:[%s615_s25 + $0x30] sm:$0xff] %v196_v39  ;;  %v200_v40 = vsel %vm195_vm6, %v321_v38, %v194_v37 }
  0x67   : > { %v201_v42 = vmul.f32 0.5, %v200_v40 }
  0x69   : > { %v204_v43 = vadd.f32 %v322_v41, %v201_v42 }
  0x6b   : > { %vm205_vm7 = vcmp.gt.f32.partialorder %v204_v43, 1.0 }
  0x6c   : > { %v206_v44 = vsel %vm205_vm7, 1.0, %v483_v2 }
  0x6d   : > { %323 = vst [vmem:[%s615_s25 + $0x38] sm:$0xff] %v206_v44 }
  0x6e   : > { %424 = shalt.err (!%p421_p3)
}
  0x6f   : > { %s425_s14 = scalar_lea.hbm %s638_s3, 1024  ;;  %s429_s21 = scalar_lea.hbm %s684_s1, 2048 }
  0x70   : > { %p426_p5 = scmp.ne.s32.totalorder %s638_s3, %s425_s14  ;;  %p430_p9 = scmp.lt.u32.totalorder %s638_s3, %s684_s1 }
  0x71   : > { %p431_p0 = scmp.lt.u32.totalorder %s429_s21, %s425_s14  ;;  %p433_p6 = scmp.lt.u32.totalorder %s425_s14, %s638_s3 }
  0x72   : > { %p427_p7 = pnand %p426_p5, %p692_p11 }
  0x73   : > { %p432_p2 = por %p431_p0, %p430_p9 }
  0x74   : > { %p428_p8 = pneg %p427_p7 }
  0x75   : > { %p434_p12 = por %p433_p6, %p432_p2 }
  0x77   : > { %p435_p13 = pnand %p434_p12, %p428_p8 }
  0x79   : > { %438 = shalt.err (!%p435_p13)
}
  0x7a   : > { %s485_s26 = smov 128   ;;  %s486_s30 = smov 256  }
  0x7b   : > { %s487_s2 = smov 8  }
  0x7c   : > { %330 = dma.vmem_to_hbm [thread:$0]  (%p692_p11), %s633_s17, 1024, %s638_s3, %s210_s4, %s485_s26, %s486_s30, %s487_s2  }
  0x7d PF: > { %s237_s25 = sand.u32 1, %s465_s6   ;;  %p693_p4 = scmp.ne.s32.totalorder %s689_s19, 0 }
  0x7e   : > { %p694_p10 = scmp.ge.s32.totalorder %s477_s9, 2  ;;  %s238_s27 = scalar_lea.sflag [#allocation4], %s237_s25 }
  0x80   : > { %p337_p1 = pnand %p694_p10, %p693_p4 }
  0x82   : > { %460 = dma.done.wait (!%p337_p1), %s238_s27, 1024  }
  0x83   : > { %462 = vsyncadd (!%p337_p1), %s238_s27, 4294966272  ;;  %p14_p3 = scmp.ge.s32.totalorder %s523_s12, 4   ;;  %s695_s6 = smov %s469_s7 }
  0x84   : > { %s696_s7 = smov %s473_s8  ;;  %s697_s8 = smov %s535_s15 }
  0x85   : > { %s698_s9 = smov %s523_s12  ;;  %16 = sbr.rel (!%p14_p3) target bundleno = 5 (0x5), region = 83 }
  0x8c   :  { %243 = vsyncpa [#allocation3], 1 }
  0x8d   :  { %245 = vsyncpa [#allocation3 + $0x1], 1 }
  0x8e   :  { %246 = vsyncpa [#allocation4], 1 }
  0x8f   :  { %248 = vsyncpa [#allocation4 + $0x1], 1 }

</bundles_post_ra>
